<compile_context>
chip_gen: v6e
topology: v6e:2x2x1
jax: 0.10.0
libtpu: 0.0.40
codegen_flags: <defaults>
</compile_context>

<pallas_src>
import functools

import jax
import jax.numpy as jnp
from jax.experimental import pallas as pl
from jax.experimental.pallas import tpu as pltpu

LANE = 128
ACC_ROWS = 64            # wide accumulator: 8 f32 vregs of ILP per fold step
ROW_ALIGN = 512          # tile_rows multiple of this (covers ACC_ROWS + packing)
BYTES_PER_BUF = 2 << 20  # target bytes per operand per pipeline buffer
MAX_TILE_ROWS = 8192     # caps in-kernel f32 working set at ~4 MiB
VMEM_LIMIT = 32 << 20    # explicit scoped-VMEM limit (>= v5e's 16 MiB default)


def _mse_single_kernel(l_hat_ref, l_ref, out_ref, *, denom):
    """Whole problem in one block: reduce + divide in one shot."""
    d = l_hat_ref[...].astype(jnp.float32) - l_ref[...].astype(jnp.float32)
    out_ref[0, 0] = jnp.sum(d * d) / jnp.float32(denom)


def _mse_tiled_kernel(l_hat_ref, l_ref, out_ref, acc_ref, *,
                      rows, tile_rows, tiles, tiles_per_split):
    """Streaming partial-sum reduction.

    grid = (num_splits, tiles_per_split):
      axis 0 ("parallel")  -> independent split, one per TensorCore on v7x,
                              own accumulator slot + own output block.
      axis 1 ("arbitrary") -> streaming reduction over row-tiles.
    """
    p = pl.program_id(0)
    i = pl.program_id(1)

    @pl.when(i == 0)
    def _():
        acc_ref[p] = jnp.zeros((ACC_ROWS, LANE), jnp.float32)

    d = l_hat_ref[...].astype(jnp.float32) - l_ref[...].astype(jnp.float32)
    sq = d * d

    # Global (unclamped) tile index; only tiles >= tiles-1 can be partial or
    # fully virtual (virtual ones re-read the clamped last block, masked to 0).
    t = p * tiles_per_split + i
    is_full = t < (tiles - 1)

    @pl.when(is_full)
    def _():
        # Full tile: no mask, pure VPU fold into the wide accumulator.
        acc_ref[p] += jnp.sum(sq.reshape(-1, ACC_ROWS, LANE), axis=0)

    @pl.when(jnp.logical_not(is_full))
    def _():
        # Edge / virtual tile: mask rows beyond the true extent.  Do NOT rely
        # on Pallas zero-filling the out-of-bounds part of the block.
        row_ids = jax.lax.broadcasted_iota(jnp.int32, (tile_rows, LANE), 0)
        valid = row_ids < (rows - t * tile_rows)
        masked = jnp.where(valid, sq, jnp.float32(0.0))
        acc_ref[p] += jnp.sum(masked.reshape(-1, ACC_ROWS, LANE), axis=0)

    @pl.when(i == pl.num_programs(1) - 1)
    def _():
        # Single expensive cross-lane/sublane reduction per split.
        out_ref[0, 0] = jnp.sum(acc_ref[p])


def mse_loss_pallas(l_hat, l):
    assert l_hat.shape == l.shape, "shape mismatch"
    n = l_hat.size
    assert n > 0, "empty input"
    itemsize = jnp.dtype(l_hat.dtype).itemsize

    # Flatten and pad ONLY to a multiple of LANE (<= 127 zeros, which
    # contribute 0 to the sum); the reshape itself is a free bitcast.
    rows = pl.cdiv(n, LANE)
    flat_hat = l_hat.reshape(-1)
    flat_l = l.reshape(-1)
    if rows * LANE != n:
        pad = rows * LANE - n
        flat_hat = jnp.pad(flat_hat, (0, pad))
        flat_l = jnp.pad(flat_l, (0, pad))
    lh2d = flat_hat.reshape(rows, LANE)
    l2d = flat_l.reshape(rows, LANE)

    cost = pl.CostEstimate(flops=3 * n, transcendentals=0,
                           bytes_accessed=2 * n * itemsize + 8)

    # Dtype-aware tile height from a byte budget (bf16/int8 get more rows),
    # capped so in-kernel f32 temporaries stay bounded.
    tile_rows = min(BYTES_PER_BUF // (LANE * itemsize), MAX_TILE_ROWS)
    tile_rows = max(ROW_ALIGN, (tile_rows // ROW_ALIGN) * ROW_ALIGN)

    if rows <= tile_rows:
        # Single-block grid-less fast path.
        out = pl.pallas_call(
            functools.partial(_mse_single_kernel, denom=float(n)),
            out_shape=jax.ShapeDtypeStruct((1, 1), jnp.float32),
            in_specs=[pl.BlockSpec(memory_space=pltpu.VMEM),
                      pl.BlockSpec(memory_space=pltpu.VMEM)],
            out_specs=pl.BlockSpec(memory_space=pltpu.SMEM),
            compiler_params=pltpu.CompilerParams(
                vmem_limit_bytes=VMEM_LIMIT),
            cost_estimate=cost,
        )(lh2d, l2d)
        return out[0, 0]

    # Tiled streaming path (rows > tile_rows  =>  tiles >= 2).
    tiles = pl.cdiv(rows, tile_rows)          # last tile may be partial
    num_splits = 2 if tiles >= 4 else 1       # one split per TC on v7x
    tiles_per_split = pl.cdiv(tiles, num_splits)

    def in_map(p, i):
        # Clamp so virtual tiles (odd tile counts) never DMA out of bounds;
        # the kernel masks their contribution to exactly zero.
        return (jnp.minimum(p * tiles_per_split + i, tiles - 1), 0)

    kernel = functools.partial(
        _mse_tiled_kernel, rows=rows, tile_rows=tile_rows, tiles=tiles,
        tiles_per_split=tiles_per_split)

    partials = pl.pallas_call(
        kernel,
        out_shape=jax.ShapeDtypeStruct((num_splits, 1), jnp.float32),
        grid_spec=pltpu.PrefetchScalarGridSpec(
            num_scalar_prefetch=0,
            grid=(num_splits, tiles_per_split),
            in_specs=[pl.BlockSpec((tile_rows, LANE), in_map),
                      pl.BlockSpec((tile_rows, LANE), in_map)],
            # One scalar partial per split; the block is resident across the
            # reduction axis and private to its split (no cross-core sharing).
            out_specs=pl.BlockSpec((1, 1), lambda p, i: (p, 0),
                                   memory_space=pltpu.SMEM),
            scratch_shapes=[pltpu.VMEM((num_splits, ACC_ROWS, LANE),
                                       jnp.float32)],
        ),
        compiler_params=pltpu.CompilerParams(
            dimension_semantics=("parallel", "arbitrary"),
            vmem_limit_bytes=VMEM_LIMIT),
        cost_estimate=cost,
    )(lh2d, l2d)

    # Combine the (at most 2) per-split partial sums and normalize.
    return jnp.sum(partials) / jnp.float32(n)


def estimator_loss(**kwargs):
    """Mirror of EstimatorLoss.forward (MSE between l_hat and l)."""
    l = kwargs["l"]
    l_hat = kwargs["l_hat"]
    loss = mse_loss_pallas(l_hat, l)
    return {"loss": loss}


if __name__ == "__main__":
    key = jax.random.PRNGKey(0)
    k1, k2 = jax.random.split(key)

    # Small NCHW-like tensors, as the PyTorch module would receive.
    B, C, H, W = 2, 4, 16, 16
    l = jax.random.normal(k1, (B, C, H, W), dtype=jnp.float32)
    l_hat = jax.random.normal(k2, (B, C, H, W), dtype=jnp.float32)

    out = estimator_loss(l=l, l_hat=l_hat)
    loss = jax.block_until_ready(out["loss"])

    # Reference check (plain JAX).
    ref = jnp.mean(jnp.square(l_hat - l))
    assert jnp.allclose(loss, ref, rtol=1e-6, atol=1e-6), (loss, ref)

    print("KERNEL_OK")
</pallas_src>

<mosaic_0001>
module attributes {stable_mosaic.version = 11 : i64} {
  func.func @_mse_single_kernel(%arg0: memref<16x128xf32, #tpu.memory_space<vmem>>, %arg1: memref<16x128xf32, #tpu.memory_space<vmem>>, %arg2: memref<1x1xf32, #tpu.memory_space<smem>>) attributes {dimension_semantics = [], scalar_prefetch = 0 : i64, scratch_operands = 0 : i64, tpu.core_type = #tpu.core_type<tc>} {
    %c0 = arith.constant 0 : index
    %c0_0 = arith.constant 0 : index
    %0 = vector.load %arg0[%c0, %c0_0] : memref<16x128xf32, #tpu.memory_space<vmem>>, vector<16x128xf32>
    %c0_1 = arith.constant 0 : index
    %c0_2 = arith.constant 0 : index
    %1 = vector.load %arg1[%c0_1, %c0_2] : memref<16x128xf32, #tpu.memory_space<vmem>>, vector<16x128xf32>
    %2 = arith.subf %0, %1 : vector<16x128xf32>
    %3 = arith.mulf %2, %2 : vector<16x128xf32>
    %4 = vector.shape_cast %3 : vector<16x128xf32> to vector<1x16x128xf32>
    %cst = arith.constant dense<0.000000e+00> : vector<1xf32>
    %5 = vector.multi_reduction <add>, %4, %cst [1, 2] : vector<1x16x128xf32> to vector<1xf32>
    %6 = vector.shape_cast %5 : vector<1xf32> to vector<1x1x1xf32>
    %7 = vector.extract %6[0, 0, 0] : f32 from vector<1x1x1xf32>
    %cst_3 = arith.constant 2.048000e+03 : f32
    %8 = arith.divf %7, %cst_3 : f32
    %c0_4 = arith.constant 0 : index
    %c0_5 = arith.constant 0 : index
    %9 = memref.load %arg2[%c0_4, %c0_5] : memref<1x1xf32, #tpu.memory_space<smem>>
    memref.store %8, %arg2[%c0_4, %c0_5] : memref<1x1xf32, #tpu.memory_space<smem>>
    return
  }
}

</mosaic_0001>

<bundles_post_ra>
// kernel: tpu_custom_call.1
= control target key start
LH: loop header
LB: loop body
LE: loop exit
PB: predicated region body
PF: predicated region fallthrough
CT: control target
= control target key end

     0   :  { %7 = vsyncpa [#allocation3], 0  ;;  %s168_s0 = inlined_call_operand.hbm [shape: f32[16,128], index: 0, kind: input, shape index: {}]   ;;  %s169_s1 = inlined_call_operand.hbm [shape: f32[16,128], index: 1, kind: input, shape index: {}]   ;;  %s170_s2 = inlined_call_operand.hbm [shape: f32[1,1], index: 2, kind: output, shape index: {}]  }
   0x1   :  { %8 = vsyncpa [#allocation6], 0 }
   0x2   :  { %9 = vsyncpa [#allocation4], 0  ;;  %s139_s9 = smov [#allocation2]  }
   0x3   :  { %s15_s10 = sshll.u32 %s139_s9, 4  ;;  %s16_s10 = int_to_ptr.vmem [resolvable:$true] %s15_s10 }
   0x4   :  { %s93_s11 = scalar_lea.vmem %s16_s10, 256  ;;  %p98_p1 = scmp.lt.s32.totalorder %s16_s10, %s16_s10 }
   0x5   :  { %p94_p0 = scmp.ne.s32.totalorder %s16_s10, %s93_s11  ;;  %p99_p2 = scmp.lt.s32.totalorder %s93_s11, %s93_s11 }
   0x7   :  { %p100_p3 = por %p99_p2, %p98_p1 }
   0x9   :  { %p101_p4 = pnand %p100_p3, %p94_p0 }
   0xb   :  { %104 = shalt.err (!%p101_p4)
}
   0xc   :  { %s140_s12 = smov 128   ;;  %s141_s13 = smov 8  }
   0xd   :  { %21 = dma.hbm_to_vmem [thread:$0]  %s168_s0, 256, %s16_s10, [#allocation3], %s140_s12, %s140_s12, %s141_s13  }
   0xe   :  { %s142_s16 = smov [#allocation5]  }
   0xf   :  { %s27_s17 = sshll.u32 %s142_s16, 4  ;;  %s28_s17 = int_to_ptr.vmem [resolvable:$true] %s27_s17 }
  0x10   :  { %s113_s18 = scalar_lea.vmem %s28_s17, 256  ;;  %p118_p6 = scmp.lt.s32.totalorder %s28_s17, %s28_s17 }
  0x11   :  { %p114_p5 = scmp.ne.s32.totalorder %s28_s17, %s113_s18  ;;  %p119_p7 = scmp.lt.s32.totalorder %s113_s18, %s113_s18 }
  0x13   :  { %p120_p8 = por %p119_p7, %p118_p6 }
  0x15   :  { %p121_p9 = pnand %p120_p8, %p114_p5 }
  0x17   :  { %124 = shalt.err (!%p121_p9)
}
  0x18   :  { %33 = dma.hbm_to_vmem [thread:$0]  %s169_s1, 256, %s28_s17, [#allocation6], %s140_s12, %s140_s12, %s141_s13  }
  0x19   :  { %133 = dma.done.wait [#allocation3], 256  }
  0x1a   :  { %134 = vsyncadd [#allocation3], 4294967040 }
  0x1b   :  { %135 = dma.done.wait [#allocation6], 256  }
  0x1c   :  { %136 = vsyncadd [#allocation6], 4294967040  ;;  %v40_v0 = vld [vmem:[#allocation2] sm:$0xff]  ;;  %v41_v1 = vld [vmem:[#allocation2 + $0x8] sm:$0xff]  ;;  %s143_s21 = smov [#allocation7]  }
  0x1d   :  { %v42_v2 = vld [vmem:[#allocation5] sm:$0xff]  ;;  %v43_v3 = vld [vmem:[#allocation5 + $0x8] sm:$0xff] }
  0x1e   :  { %v44_v4 = vsub.f32 %v40_v0, %v42_v2  ;;  %v45_v5 = vsub.f32 %v41_v1, %v43_v3 }
  0x20   :  { %v46_v6 = vmul.f32 %v44_v4, %v44_v4  ;;  %v47_v7 = vmul.f32 %v45_v5, %v45_v5 }
  0x22   :  { %v48_v8 = vadd.f32 %v47_v7, %v46_v6 }
  0x24   :  { %49 = vadd.xlane.f32.xlu0 %v48_v8 }
  0xad   :  { %v50_v9 = vpop.xlane.xlu0 %49 }
  0xae   :  { %v51_v10 = vrot.slane %v50_v9, 4 }
  0xb0   :  { %v52_v11 = vadd.f32 %v51_v10, %v50_v9 }
  0xb2   :  { %v53_v12 = vrot.slane %v52_v11, 2 }
  0xb4   :  { %v54_v13 = vadd.f32 %v53_v12, %v52_v11 }
  0xb6   :  { %v55_v14 = vrot.slane %v54_v13, 1 }
  0xb8   :  { %v56_v15 = vadd.f32 %v55_v14, %v54_v13 }
  0xba   :  { %78 = vpush %v56_v15 }
  0xeb   :  { %s79_s0 = spop %78 }
  0xec   :  { %s60_s1 = smul.f32 0.00048828125, %s79_s0 }
  0xee   :  { %62 = sst [smem:[#allocation7]] %s60_s1 }
  0xef   :  { %70 = dma.smem_to_hbm %s143_s21, 16, %s170_s2, [#allocation4]  }
  0xf0   :  { %137 = dma.done.wait [#allocation4], 16  }
  0xf1   :  { %138 = vsyncadd [#allocation4], 4294967280 }
  0xf2   :  { %74 = sfence }
  0xf3   :  { %75 = vsyncpa [#allocation3], 1 }
  0xf4   :  { %76 = vsyncpa [#allocation6], 1 }
  0xf5   :  { %77 = vsyncpa [#allocation4], 1 }

</bundles_post_ra>
